<compile_context>
chip_gen: v7x
topology: tpu7x:2x2x1
jax: 0.10.0
libtpu: 0.0.40
codegen_flags: <defaults>
</compile_context>

<pallas_src>
import jax
import jax.numpy as jnp
from jax.experimental import pallas as pl
from jax.experimental.pallas import tpu as pltpu

_LANE = 128
_SUBLANE = 8


def _round_up(n, m):
    return ((n + m - 1) // m) * m


def _mlp_kernel(x_ref, w1_ref, b1_ref, w2_ref, b2_ref, o_ref):
    # x_ref: (TB, D0) bf16; weights bf16; biases f32; output f32, lane-padded.
    # ReLU on the raw input (exact in bf16, no precision change).
    h = jnp.maximum(x_ref[...], 0)
    # Linear 1: bf16 x bf16 on the MXU with f32 accumulation; bias add in f32.
    h = jnp.dot(h, w1_ref[...], preferred_element_type=jnp.float32) + b1_ref[...]
    # Hidden ReLU kept in f32 (VALU has slack under the MXU; avoids bf16 ALU on v5e).
    h = jnp.maximum(h, 0.0)
    # Linear 2: cast to bf16 only at the dot input; f32 accumulate + f32 bias.
    o_ref[...] = (jnp.dot(h.astype(w2_ref.dtype), w2_ref[...],
                          preferred_element_type=jnp.float32)
                  + b2_ref[...]).astype(o_ref.dtype)


def prepare_params(w1, b1, w2, b2, compute_dtype=jnp.bfloat16):
    """One-time prep (hoisted out of the forward path):
    - transpose PyTorch [out, in] weights to [in, out],
    - cast matmul operands to bf16 (biases stay f32, added after f32 accumulation),
    - zero-pad the final output feature dim up to 128 lanes for lane-dense stores.
    Returns (w1_t, b1_2d, w2_t_padded, b2_2d_padded, d_out)."""
    D1, D0 = w1.shape
    D2 = w2.shape[0]
    D2p = _round_up(D2, _LANE)

    w1_t = jnp.asarray(w1).T.astype(compute_dtype)                       # [D0, D1]
    b1_2d = jnp.asarray(b1, jnp.float32).reshape(1, D1)                  # [1, D1]
    w2_t = jnp.zeros((D1, D2p), compute_dtype).at[:, :D2].set(
        jnp.asarray(w2).T.astype(compute_dtype))                         # [D1, D2p]
    b2_2d = jnp.zeros((1, D2p), jnp.float32).at[:, :D2].set(
        jnp.asarray(b2, jnp.float32))                                    # [1, D2p]
    return w1_t, b1_2d, w2_t, b2_2d, D2


def mlp_forward(x, w1_t, b1_2d, w2_t, b2_2d, d_out, *, block_b=256):
    """Fused ReLU -> Linear -> ReLU -> Linear. x: [B, D0]; returns [B, d_out] f32.

    Batch is tiled over a 1-D 'parallel' grid (auto double-buffered x/out DMAs,
    sharded across v7x's two TensorCores); the tiny bf16 weights/biases use a
    constant index_map so they stay VMEM-resident across all grid steps.
    block_b=256 keeps the double-buffered x/out tiles far under the scoped VMEM
    limit on v5e/v6e (128 MiB) and v7x (64 MiB) alike; raise it for very large B.
    """
    B, D0 = x.shape
    D1 = w1_t.shape[1]
    D2p = w2_t.shape[1]

    # Batch tile: multiple of 8 sublanes; pad B so the grid divides evenly.
    TB = min(block_b, _round_up(B, _SUBLANE))
    Bp = _round_up(B, TB)

    xb = x.astype(w1_t.dtype)            # bf16 operand: halves HBM->VMEM DMA bytes
    if Bp != B:
        xb = jnp.pad(xb, ((0, Bp - B), (0, 0)))

    flops = 2 * Bp * (D0 * D1 + D1 * D2p)
    bytes_accessed = (Bp * D0 * 2 + D0 * D1 * 2 + D1 * D2p * 2
                      + 4 * (D1 + D2p) + Bp * D2p * 4)

    out = pl.pallas_call(
        _mlp_kernel,
        out_shape=jax.ShapeDtypeStruct((Bp, D2p), jnp.float32),
        grid=(Bp // TB,),
        in_specs=[
            pl.BlockSpec((TB, D0), lambda i: (i, 0)),     # batch-tiled activations
            pl.BlockSpec((D0, D1), lambda i: (0, 0)),     # weights resident across steps
            pl.BlockSpec((1, D1), lambda i: (0, 0)),
            pl.BlockSpec((D1, D2p), lambda i: (0, 0)),
            pl.BlockSpec((1, D2p), lambda i: (0, 0)),
        ],
        out_specs=pl.BlockSpec((TB, D2p), lambda i: (i, 0)),   # lane-dense (128) output
        compiler_params=pltpu.CompilerParams(
            dimension_semantics=("parallel",)),           # v7x: batch sharded over 2 TCs
        cost_estimate=pl.CostEstimate(
            flops=flops, transcendentals=0, bytes_accessed=bytes_accessed),
    )(xb, w1_t, b1_2d, w2_t, b2_2d)

    # Strip batch padding and the lane padding of the output feature dim.
    return out[:B, :d_out]


def init_linear(key, fan_in, fan_out, dtype=jnp.float32):
    """Deterministic init matching PyTorch nn.Linear default (uniform +/- 1/sqrt(fan_in))."""
    kw, kb = jax.random.split(key)
    bound = 1.0 / jnp.sqrt(jnp.asarray(fan_in, dtype))
    w = jax.random.uniform(kw, (fan_out, fan_in), dtype, -bound, bound)
    b = jax.random.uniform(kb, (fan_out,), dtype, -bound, bound)
    return w, b


if __name__ == "__main__":
    layer_sizes = [32, 64, 16]          # MLP(layer_sizes=[32, 64, 16], final_relu=False)
    batch = 8

    key = jax.random.PRNGKey(0)
    kx, k1, k2 = jax.random.split(key, 3)

    x = jax.random.normal(kx, (batch, layer_sizes[0]), jnp.float32)
    w1, b1 = init_linear(k1, layer_sizes[0], layer_sizes[1])
    w2, b2 = init_linear(k2, layer_sizes[1], layer_sizes[2])

    # One-time parameter preparation (NOT part of the per-call hot path).
    params = prepare_params(w1, b1, w2, b2)

    out = mlp_forward(x, *params)
    out = jax.block_until_ready(out)

    # Pure-JAX f32 reference of the exact module semantics.
    h = jnp.maximum(x, 0.0)
    h = h @ w1.T + b1
    h = jnp.maximum(h, 0.0)
    ref = h @ w2.T + b2

    assert out.shape == (batch, layer_sizes[-1])
    # bf16 operands with f32 accumulation -> relaxed tolerance.
    assert jnp.allclose(out, ref, atol=2e-2, rtol=2e-2), \
        float(jnp.max(jnp.abs(out - ref)))

    print("KERNEL_OK")
</pallas_src>

<mosaic_0001>
module attributes {stable_mosaic.version = 11 : i64} {
  func.func @_mlp_kernel(%arg0: i32, %arg1: memref<8x32xbf16, #tpu.memory_space<vmem>>, %arg2: memref<32x64xbf16, #tpu.memory_space<vmem>>, %arg3: memref<1x64xf32, #tpu.memory_space<vmem>>, %arg4: memref<64x128xbf16, #tpu.memory_space<vmem>>, %arg5: memref<1x128xf32, #tpu.memory_space<vmem>>, %arg6: memref<8x128xf32, #tpu.memory_space<vmem>>) attributes {dimension_semantics = [#tpu.dimension_semantics<parallel>], iteration_bounds = array<i64: 1>, scalar_prefetch = 0 : i64, scratch_operands = 0 : i64, tpu.core_type = #tpu.core_type<tc>, window_params = [{transform_indices = @transform_0, window_bounds = array<i64: 8, 32>}, {pipeline_mode = #tpu.pipeline_mode<synchronous>, transform_indices = @transform_1, window_bounds = array<i64: 32, 64>}, {pipeline_mode = #tpu.pipeline_mode<synchronous>, transform_indices = @transform_2, window_bounds = array<i64: 1, 64>}, {pipeline_mode = #tpu.pipeline_mode<synchronous>, transform_indices = @transform_3, window_bounds = array<i64: 64, 128>}, {pipeline_mode = #tpu.pipeline_mode<synchronous>, transform_indices = @transform_4, window_bounds = array<i64: 1, 128>}, {transform_indices = @transform_5, window_bounds = array<i64: 8, 128>}]} {
    %c0 = arith.constant 0 : index
    %c0_0 = arith.constant 0 : index
    %0 = vector.load %arg1[%c0, %c0_0] : memref<8x32xbf16, #tpu.memory_space<vmem>>, vector<8x32xbf16>
    %cst = arith.constant 0.000000e+00 : bf16
    %1 = vector.broadcast %cst : bf16 to vector<8x32xbf16>
    %2 = arith.maximumf %0, %1 : vector<8x32xbf16>
    %c0_1 = arith.constant 0 : index
    %c0_2 = arith.constant 0 : index
    %3 = vector.load %arg2[%c0_1, %c0_2] : memref<32x64xbf16, #tpu.memory_space<vmem>>, vector<32x64xbf16>
    %cst_3 = arith.constant dense<0.000000e+00> : vector<8x64xf32>
    %4 = tpu.matmul %2, %3, %cst_3 {dimension_numbers = #tpu.dot_dimension_numbers<[1], [0], [0], [1], [0, 0, 1, 1], [], []>} : vector<8x32xbf16>, vector<32x64xbf16>, vector<8x64xf32> -> vector<8x64xf32>
    %c0_4 = arith.constant 0 : index
    %c0_5 = arith.constant 0 : index
    %5 = vector.load %arg3[%c0_4, %c0_5] : memref<1x64xf32, #tpu.memory_space<vmem>>, vector<1x64xf32>
    %6 = vector.broadcast %5 : vector<1x64xf32> to vector<8x64xf32>
    %7 = arith.addf %4, %6 : vector<8x64xf32>
    %cst_6 = arith.constant 0.000000e+00 : f32
    %8 = vector.broadcast %cst_6 : f32 to vector<8x64xf32>
    %9 = arith.maximumf %7, %8 : vector<8x64xf32>
    %10 = arith.truncf %9 : vector<8x64xf32> to vector<8x64xbf16>
    %c0_7 = arith.constant 0 : index
    %c0_8 = arith.constant 0 : index
    %11 = vector.load %arg4[%c0_7, %c0_8] : memref<64x128xbf16, #tpu.memory_space<vmem>>, vector<64x128xbf16>
    %cst_9 = arith.constant dense<0.000000e+00> : vector<8x128xf32>
    %12 = tpu.matmul %10, %11, %cst_9 {dimension_numbers = #tpu.dot_dimension_numbers<[1], [0], [0], [1], [0, 0, 1, 1], [], []>} : vector<8x64xbf16>, vector<64x128xbf16>, vector<8x128xf32> -> vector<8x128xf32>
    %c0_10 = arith.constant 0 : index
    %c0_11 = arith.constant 0 : index
    %13 = vector.load %arg5[%c0_10, %c0_11] : memref<1x128xf32, #tpu.memory_space<vmem>>, vector<1x128xf32>
    %14 = vector.broadcast %13 : vector<1x128xf32> to vector<8x128xf32>
    %15 = arith.addf %12, %14 : vector<8x128xf32>
    %c0_12 = arith.constant 0 : index
    %c0_13 = arith.constant 0 : index
    %16 = vector.load %arg6[%c0_12, %c0_13] : memref<8x128xf32, #tpu.memory_space<vmem>>, vector<8x128xf32>
    tpu.vector_store %arg6[%c0_12, %c0_13], %15 {strides = array<i32>} : memref<8x128xf32, #tpu.memory_space<vmem>>, vector<8x128xf32>,
    return
  }
  func.func @transform_0(%arg0: i32) -> (i32, i32) {
    %c0_i32 = arith.constant 0 : i32
    %c0_i32_0 = arith.constant 0 : i32
    return %arg0, %c0_i32 : i32, i32
  }
  func.func @transform_1(%arg0: i32) -> (i32, i32) {
    %c0_i32 = arith.constant 0 : i32
    %c0_i32_0 = arith.constant 0 : i32
    %c0_i32_1 = arith.constant 0 : i32
    return %c0_i32, %c0_i32_0 : i32, i32
  }
  func.func @transform_2(%arg0: i32) -> (i32, i32) {
    %c0_i32 = arith.constant 0 : i32
    %c0_i32_0 = arith.constant 0 : i32
    %c0_i32_1 = arith.constant 0 : i32
    return %c0_i32, %c0_i32_0 : i32, i32
  }
  func.func @transform_3(%arg0: i32) -> (i32, i32) {
    %c0_i32 = arith.constant 0 : i32
    %c0_i32_0 = arith.constant 0 : i32
    %c0_i32_1 = arith.constant 0 : i32
    return %c0_i32, %c0_i32_0 : i32, i32
  }
  func.func @transform_4(%arg0: i32) -> (i32, i32) {
    %c0_i32 = arith.constant 0 : i32
    %c0_i32_0 = arith.constant 0 : i32
    %c0_i32_1 = arith.constant 0 : i32
    return %c0_i32, %c0_i32_0 : i32, i32
  }
  func.func @transform_5(%arg0: i32) -> (i32, i32) {
    %c0_i32 = arith.constant 0 : i32
    %c0_i32_0 = arith.constant 0 : i32
    return %arg0, %c0_i32 : i32, i32
  }
}

</mosaic_0001>

<bundles_post_ra>
// kernel: tpu_custom_call.1
= control target key start
LH: loop header
LB: loop body
LE: loop exit
PB: predicated region body
PF: predicated region fallthrough
CT: control target
= control target key end

     0   :  { %10 = vsyncpa [#allocation3], 0  ;;  %s478_s0 = inlined_call_operand.hbm [shape: bf16[8,32], index: 0, kind: input, shape index: {}]   ;;  %s479_s1 = inlined_call_operand.hbm [shape: bf16[32,64], index: 1, kind: input, shape index: {}]   ;;  %s480_s2 = inlined_call_operand.vmem [shape: f32[1,64], index: 2, kind: input, shape index: {}]   ;;  %s481_s3 = inlined_call_operand.hbm [shape: bf16[64,128], index: 3, kind: input, shape index: {}]   ;;  %s482_s4 = inlined_call_operand.vmem [shape: f32[1,128], index: 4, kind: input, shape index: {}]   ;;  %s483_s5 = inlined_call_operand.hbm [shape: f32[8,128], index: 5, kind: output, shape index: {}]  }
   0x1   :  { %11 = vsyncpa [#allocation6], 0 }
   0x2   :  { %12 = vsyncpa [#allocation4], 0  ;;  %s379_s18 = smov [#allocation5]   ;;  %s285_s22 = scalar_lea.hbm %s479_s1, 256 }
   0x3   :  { %s28_s19 = sshll.u32 %s379_s18, 4  ;;  %p286_p0 = scmp.ne.s32.totalorder %s479_s1, %s285_s22  ;;  %s29_s19 = int_to_ptr.vmem [resolvable:$true] %s28_s19 }
   0x4   :  { %p289_p1 = scmp.lt.u32.totalorder %s285_s22, %s479_s1 }
   0x6   :  { %p291_p2 = pnand %p289_p1, %p286_p0 }
   0x8   :  { %294 = shalt.err (!%p291_p2)
}
   0x9   :  { %s295_s27 = scalar_lea.vmem %s29_s19, 256  ;;  %p300_p4 = scmp.lt.s32.totalorder %s29_s19, %s29_s19 }
   0xa   :  { %p296_p3 = scmp.ne.s32.totalorder %s29_s19, %s295_s27  ;;  %p301_p5 = scmp.lt.s32.totalorder %s295_s27, %s295_s27 }
   0xc   :  { %p302_p6 = por %p301_p5, %p300_p4 }
   0xe   :  { %p303_p7 = pnand %p302_p6, %p296_p3 }
  0x10   :  { %306 = shalt.err (!%p303_p7)
}
  0x11   :  { %s380_s28 = smov 64   ;;  %s381_s29 = smov 4  }
  0x12   :  { %34 = dma.hbm_to_vmem [thread:$0]  %s479_s1, 256, %s29_s19, [#allocation6], %s380_s28, %s380_s28, %s381_s29  }
  0x13   :  { %s382_s7 = smov [#allocation2]   ;;  %s383_s9 = smov [#allocation7]  }
  0x14   :  { %s19_s8 = sshll.u32 %s382_s7, 4  ;;  %s42_s10 = sshll.u32 %s383_s9, 4  ;;  %s20_s8 = int_to_ptr.vmem [resolvable:$true] %s19_s8  ;;  %s43_s10 = int_to_ptr.vmem [resolvable:$true] %s42_s10 }
  0x15   :  { %s307_s13 = scalar_lea.hbm %s478_s0, 64 }
  0x16   :  { %p308_p8 = scmp.ne.s32.totalorder %s478_s0, %s307_s13  ;;  %p311_p9 = scmp.lt.u32.totalorder %s307_s13, %s478_s0 }
  0x18   :  { %p313_p10 = pnand %p311_p9, %p308_p8 }
  0x1a   :  { %316 = shalt.err (!%p313_p10)
}
  0x1b   :  { %s317_s1 = scalar_lea.vmem %s20_s8, 64  ;;  %p322_p12 = scmp.lt.s32.totalorder %s20_s8, %s20_s8 }
  0x1c   :  { %p318_p11 = scmp.ne.s32.totalorder %s20_s8, %s317_s1  ;;  %p323_p13 = scmp.lt.s32.totalorder %s317_s1, %s317_s1 }
  0x1e   :  { %p324_p0 = por %p323_p13, %p322_p12 }
  0x20   :  { %p325_p1 = pnand %p324_p0, %p318_p11 }
  0x22   :  { %328 = shalt.err (!%p325_p1)
}
  0x23   :  { %22 = dma.hbm_to_vmem [thread:$0]  %s478_s0, 64, %s20_s8, [#allocation3]  }
  0x24   :  { %s329_s22 = scalar_lea.hbm %s481_s3, 512 }
  0x25   :  { %p330_p2 = scmp.ne.s32.totalorder %s481_s3, %s329_s22  ;;  %p333_p3 = scmp.lt.u32.totalorder %s329_s22, %s481_s3 }
  0x27   :  { %p335_p4 = pnand %p333_p3, %p330_p2 }
  0x29   :  { %338 = shalt.err (!%p335_p4)
}
  0x2a   :  { %s339_s27 = scalar_lea.vmem %s43_s10, 512  ;;  %p344_p6 = scmp.lt.s32.totalorder %s43_s10, %s43_s10 }
  0x2b   :  { %p340_p5 = scmp.ne.s32.totalorder %s43_s10, %s339_s27  ;;  %p345_p7 = scmp.lt.s32.totalorder %s339_s27, %s339_s27 }
  0x2d   :  { %p346_p8 = por %p345_p7, %p344_p6 }
  0x2f   :  { %p347_p9 = pnand %p346_p8, %p340_p5 }
  0x31   :  { %350 = shalt.err (!%p347_p9)
}
  0x32   :  { %48 = dma.hbm_to_vmem [thread:$0]  %s481_s3, 512, %s43_s10, [#allocation6], %s380_s28, %s380_s28, %s381_s29  }
  0x33   :  { %373 = dma.done.wait [#allocation3], 64  }
  0x34   :  { %374 = vsyncadd [#allocation3], 4294967232 }
  0x35   :  { %375 = dma.done.wait [#allocation6], 768  }
  0x36   :  { %376 = vsyncadd [#allocation6], 4294966528  ;;  %v384_v0 = vmov 0.0   ;;  %vm385_vm0 = vmmov 0   ;;  %v279_v1 = vld [vmem:[#allocation5] sm:$0xff]   ;;  %v280_v2 = vld [vmem:[#allocation5 + $0x8] sm:$0xff]  }
  0x37   :  { %250 = vmatprep.subr.bf16.mxu0 %v384_v0  ;;  %254 = vmatprep.mubr.msk.bf16.mxu0 %vm385_vm0, %v384_v0  ;;  %v61_v3 = vld [vmem:[#allocation2] sm:$0xf]  ;;  %v281_v4 = vld [vmem:[#allocation7] sm:$0xff]   ;;  %v386_v6 = vmov 0   ;;  %vm86_vm1 = vcmask 261120   ;;  %v283_v8 = vld [vmem:[#allocation7 + $0x10] sm:$0xff]  }
  0x38   :  { %258 = vmatprep.subr.bf16.mxu1 %v384_v0  ;;  %266 = vmatprep.mubr.msk.bf16.mxu1 %vm385_vm0, %v384_v0  ;;  %v282_v5 = vld [vmem:[#allocation7 + $0x8] sm:$0xff]   ;;  %v62_v7 = vmax.bf16 %v386_v6, %v61_v3  ;;  %v284_v9 = vld [vmem:[#allocation7 + $0x18] sm:$0xff]   ;;  %vm171_vm2 = vcmask 523264   ;;  %s387_s7 = smov [#allocation8]  }
  0x39   :  { %251 = vmatpush3.bf16.msra.mxu0 %v279_v1  ;;  %259 = vmatpush3.bf16.msra.mxu1 %v281_v4  ;;  %v232_v10 = vld [vmem:[%s480_s2] ss:$0 sm:$0xff]  ;;  %s222_s8 = sshll.u32 %s387_s7, 4  ;;  %s223_s8 = int_to_ptr.vmem [resolvable:$true] %s222_s8 }
  0x3a   :  { %252 = vmatprep.subr.bf16.mxu0 %v384_v0  ;;  %260 = vmatprep.subr.bf16.mxu1 %v384_v0  ;;  %v236_v18 = vld [vmem:[%s482_s4] ss:$0 sm:$0xff]  ;;  %s351_s2 = scalar_lea.vmem %s223_s8, 128  ;;  %p356_p11 = scmp.lt.s32.totalorder %s223_s8, %s223_s8 }
  0x3b   :  { %p352_p10 = scmp.ne.s32.totalorder %s223_s8, %s351_s2  ;;  %p357_p12 = scmp.lt.s32.totalorder %s351_s2, %s351_s2 }
  0x3d   :  { %253 = vmatpush3.bf16.msra.mxu0 %v280_v2  ;;  %261 = vmatpush3.bf16.msra.mxu1 %v282_v5  ;;  %p358_p13 = por %p357_p12, %p356_p11 }
  0x3e   :  { %262 = vmatprep.subr.bf16.mxu1 %v384_v0 }
  0x3f   :  { %p359_p0 = pnand %p358_p13, %p352_p10 }
  0x40   :  { %255 = vmatmul.mubr.msk.bf16.vlgmr.msra.gmra.mrb[0].mxu0 %vm86_vm1, %v62_v7 }
  0x41   :  { %263 = vmatpush3.bf16.msra.mxu1 %v283_v8 }
  0x42   :  { %264 = vmatprep.subr.bf16.mxu1 %v384_v0 }
  0x45   :  { %265 = vmatpush3.bf16.msra.mxu1 %v284_v9 }
 0x113   :  { %v124_v11 = vpop.f32.mrb[0].mxu0 }
 0x114   :  { %v125_v12 = vadd.f32 %v232_v10, %v124_v11  ;;  %v256_v13 = vpop.f32.mrb[1].mxu0 }
 0x115   :  { %v127_v14 = vpop.f32.mrb[2].mxu0 }
 0x116   :  { %v130_v15 = vmax.f32 %v125_v12, 0.0  ;;  %v257_v16 = vpop.f32.mrb[3].mxu0 }
 0x118   :  { %v131_v17 = vpack.c.bf16 %v130_v15, %v130_v15 }
 0x11a   :  { %267 = vmatmul.mubr.msk.bf16.vlgmr.msra.gmra.mrb[0].mxu1 %vm171_vm2, %v131_v17 }
 0x1ed   :  { %v209_v19 = vpop.f32.mrb[0].mxu1 }
 0x1ee   :  { %v210_v20 = vadd.f32 %v236_v18, %v209_v19  ;;  %v268_v21 = vpop.f32.mrb[1].mxu1 }
 0x1ef   :  { %v212_v22 = vpop.f32.mrb[2].mxu1 }
 0x1f0   :  { %215 = vst [vmem:[#allocation8] sm:$0xff] %v210_v20  ;;  %v269_v23 = vpop.f32.mrb[3].mxu1 }
 0x1f1   :  { %362 = shalt.err (!%p359_p0)
}
 0x1f2   :  { %s363_s4 = scalar_lea.hbm %s483_s5, 128 }
 0x1f3   :  { %p364_p1 = scmp.ne.s32.totalorder %s483_s5, %s363_s4  ;;  %p367_p2 = scmp.lt.u32.totalorder %s363_s4, %s483_s5 }
 0x1f5   :  { %p369_p3 = pnand %p367_p2, %p364_p1 }
 0x1f7   :  { %372 = shalt.err (!%p369_p3)
}
 0x1f8   :  { %225 = dma.vmem_to_hbm [thread:$0]  %s223_s8, 128, %s483_s5, [#allocation4]  }
 0x1f9   :  { %377 = dma.done.wait [#allocation4], 128  }
 0x1fa   :  { %378 = vsyncadd [#allocation4], 4294967168 }
 0x1fb   :  { %229 = vsyncpa [#allocation3], 1 }
 0x1fc   :  { %230 = vsyncpa [#allocation6], 1 }
 0x1fd   :  { %231 = vsyncpa [#allocation4], 1 }

</bundles_post_ra>
